<compile_context>
chip_gen: v6e
topology: v6e:2x2x1
jax: 0.10.0
libtpu: 0.0.40
codegen_flags: <defaults>
</compile_context>

<pallas_src>
import jax
import jax.numpy as jnp
from jax.experimental import pallas as pl
from jax.experimental.pallas import tpu as pltpu


def _mul_kernel(w_ref, x_ref, o_ref):
    # w_ref: (1,) f32 scalar in SMEM; one scalar load per block.
    w = w_ref[0]
    o_ref[...] = (x_ref[...] * w).astype(o_ref.dtype)


def _block_bytes_and_vmem_limit():
    """Generation-specific streaming block size + scoped VMEM limit."""
    try:
        kind = jax.devices()[0].device_kind.lower()
    except Exception:  # defensive: fall back to conservative defaults
        kind = ""
    mib = 1024 * 1024
    if "v7" in kind:
        # ~3.2 TB/s HBM per TC, 64 MiB VMEM: 6 MiB blocks (24 MiB dbl-buffered).
        return 6 * mib, 48 * mib
    if "v6" in kind:
        # 128 MiB VMEM, ~1.4 TB/s HBM: 8 MiB blocks (32 MiB dbl-buffered).
        return 8 * mib, 64 * mib
    # v5e / v5p / unknown: 4 MiB blocks (16 MiB dbl-buffered) is safe and
    # already puts the ~0.35 us per-step overhead in the noise at <=1.4 TB/s.
    return 4 * mib, 48 * mib


def mul_pallas(x: jax.Array, weight, *, donate_x: bool = False) -> jax.Array:
    """Elementwise x * weight (scalar), streamed through a Pallas TPU kernel."""
    orig_shape = x.shape
    dtype = x.dtype
    total = x.size

    # NOTE: assumes floating-point x (as in resnet9 activations); the result is
    # cast back to x.dtype, matching PyTorch's tensor*python-scalar promotion.
    # TODO(synk): add int/bool promotion rules if non-float activations appear.

    # Lane-dense, zero-copy layout: the largest lane width (multiple of 128)
    # that exactly divides the element count makes the (rows, lane) view a
    # pure bitcast of x (no pad/slice copies => no extra HBM traffic).
    lane = None
    for cand in (1024, 512, 256, 128):
        if total % cand == 0:
            lane = cand
            break

    flat = x.reshape(-1)
    padded_total = total
    if lane is None:
        # Rare irregular size (not a multiple of 128): pad fallback.
        lane = 128
        padded_total = pl.cdiv(total, lane) * lane
        flat = jnp.pad(flat, (0, padded_total - total))
    rows = padded_total // lane
    x2d = flat.reshape(rows, lane)

    # Dtype-aware sublane quantum: a vreg holds [8,128] f32, [16,128] bf16,
    # [32,128] int8/fp8 -- keep tile_rows a multiple of it so every steady-state
    # store is an unmasked vst.
    itemsize = jnp.dtype(dtype).itemsize
    sublane = max(8, 32 // max(1, itemsize))

    block_bytes, vmem_limit = _block_bytes_and_vmem_limit()
    tile_rows = (block_bytes // (lane * itemsize)) // sublane * sublane
    tile_rows = max(sublane, tile_rows)
    tile_rows = min(tile_rows, rows)

    # Split into >= 2 balanced blocks only when each half is big enough that
    # its DMA time exceeds the per-grid-step overhead; on v5e/v6e the grid is a
    # serial loop, so splitting tiny tensors only adds launch overhead.  The
    # halves are quantum-aligned and balanced so both v7x TensorCores stay busy.
    total_bytes = rows * lane * itemsize
    if tile_rows >= rows and total_bytes >= 2 * 1024 * 1024:
        half = pl.cdiv(rows, 2)
        tile_rows = pl.cdiv(half, sublane) * sublane

    grid = (pl.cdiv(rows, tile_rows),)

    # Scalar weight in SMEM (f32): works for static Python floats and traced
    # jax.Arrays alike, no recompile per distinct value.
    w1 = jnp.asarray(weight, dtype=jnp.float32).reshape(1)

    # Optional buffer donation: avoids allocating a second full-size HBM buffer
    # when the caller no longer needs x.  (Input 0 is the SMEM weight.)
    alias = {1: 0} if donate_x else {}

    out2d = pl.pallas_call(
        _mul_kernel,
        out_shape=jax.ShapeDtypeStruct((rows, lane), dtype),
        grid=grid,
        in_specs=[
            pl.BlockSpec(memory_space=pltpu.MemorySpace.SMEM),
            pl.BlockSpec((tile_rows, lane), lambda i: (i, 0)),
        ],
        out_specs=pl.BlockSpec((tile_rows, lane), lambda i: (i, 0)),
        compiler_params=pltpu.CompilerParams(
            dimension_semantics=("parallel",),
            vmem_limit_bytes=vmem_limit,
        ),
        input_output_aliases=alias,
    )(w1, x2d)

    out_flat = out2d.reshape(-1)
    if padded_total != total:
        out_flat = out_flat[:total]
    return out_flat.reshape(orig_shape)


if __name__ == "__main__":
    key = jax.random.PRNGKey(0)
    # Small NCHW input consistent with a conv-net feature map.
    x = jax.random.normal(key, (2, 4, 16, 16), dtype=jnp.float32)

    # resnet9's Mul is a fixed scalar.
    weight = 0.5

    ref = x * weight  # reference computed first (safe even if x were donated)

    out = mul_pallas(x, weight)
    out = jax.block_until_ready(out)

    assert out.shape == x.shape and out.dtype == x.dtype
    assert jnp.allclose(out, ref, atol=1e-6, rtol=1e-6)

    print("KERNEL_OK")
</pallas_src>

<mosaic_0001>
module attributes {stable_mosaic.version = 11 : i64} {
  func.func @_mul_kernel(%arg0: i32, %arg1: memref<1xf32, #tpu.memory_space<smem>>, %arg2: memref<2x1024xf32, #tpu.memory_space<vmem>>, %arg3: memref<2x1024xf32, #tpu.memory_space<vmem>>) attributes {dimension_semantics = [#tpu.dimension_semantics<parallel>], iteration_bounds = array<i64: 1>, scalar_prefetch = 0 : i64, scratch_operands = 0 : i64, tpu.core_type = #tpu.core_type<tc>, window_params = [{transform_indices = @transform_0, window_bounds = array<i64: 1>}, {transform_indices = @transform_1, window_bounds = array<i64: 2, 1024>}, {transform_indices = @transform_2, window_bounds = array<i64: 2, 1024>}]} {
    %c0 = arith.constant 0 : index
    %0 = memref.load %arg1[%c0] : memref<1xf32, #tpu.memory_space<smem>>
    %c0_0 = arith.constant 0 : index
    %c0_1 = arith.constant 0 : index
    %1 = vector.load %arg2[%c0_0, %c0_1] : memref<2x1024xf32, #tpu.memory_space<vmem>>, vector<2x1024xf32>
    %2 = vector.broadcast %0 : f32 to vector<2x1024xf32>
    %3 = arith.mulf %1, %2 : vector<2x1024xf32>
    %c0_2 = arith.constant 0 : index
    %c0_3 = arith.constant 0 : index
    %4 = vector.load %arg3[%c0_2, %c0_3] : memref<2x1024xf32, #tpu.memory_space<vmem>>, vector<2x1024xf32>
    tpu.vector_store %arg3[%c0_2, %c0_3], %3 {strides = array<i32>} : memref<2x1024xf32, #tpu.memory_space<vmem>>, vector<2x1024xf32>,
    return
  }
  func.func @transform_0(%arg0: i32) -> i32 {
    %c0_i32 = arith.constant 0 : i32
    %c0_i32_0 = arith.constant 0 : i32
    return %c0_i32 : i32
  }
  func.func @transform_1(%arg0: i32) -> (i32, i32) {
    %c0_i32 = arith.constant 0 : i32
    %c0_i32_0 = arith.constant 0 : i32
    return %arg0, %c0_i32 : i32, i32
  }
  func.func @transform_2(%arg0: i32) -> (i32, i32) {
    %c0_i32 = arith.constant 0 : i32
    %c0_i32_0 = arith.constant 0 : i32
    return %arg0, %c0_i32 : i32, i32
  }
}

</mosaic_0001>

<bundles_post_ra>
// kernel: tpu_custom_call.1
= control target key start
LH: loop header
LB: loop body
LE: loop exit
PB: predicated region body
PF: predicated region fallthrough
CT: control target
= control target key end

     0   :  { %8 = vsyncpa [#allocation4], 0  ;;  %s120_s0 = inlined_call_operand.<no memory space> [shape: f32[1], index: 0, kind: input, shape index: {}]   ;;  %s121_s1 = inlined_call_operand.hbm [shape: f32[2,1024], index: 1, kind: input, shape index: {}]   ;;  %s122_s2 = inlined_call_operand.hbm [shape: f32[2,1024], index: 2, kind: output, shape index: {}]  }
   0x1   :  { %9 = vsyncpa [#allocation5], 0  ;;  %s94_s9 = smov [#allocation3]  }
   0x2   :  { %s18_s10 = sshll.u32 %s94_s9, 4  ;;  %s19_s10 = int_to_ptr.vmem [resolvable:$true] %s18_s10 }
   0x3   :  { %s58_s11 = scalar_lea.vmem %s19_s10, 256  ;;  %p63_p1 = scmp.lt.s32.totalorder %s19_s10, %s19_s10 }
   0x4   :  { %p59_p0 = scmp.ne.s32.totalorder %s19_s10, %s58_s11  ;;  %p64_p2 = scmp.lt.s32.totalorder %s58_s11, %s58_s11 }
   0x6   :  { %p65_p3 = por %p64_p2, %p63_p1 }
   0x8   :  { %p66_p4 = pnand %p65_p3, %p59_p0 }
   0xa   :  { %69 = shalt.err (!%p66_p4)
}
   0xb   :  { %21 = dma.hbm_to_vmem [thread:$0]  %s121_s1, 256, %s19_s10, [#allocation4]  }
   0xc   :  { %90 = dma.done.wait [#allocation4], 256  }
   0xd   :  { %91 = vsyncadd [#allocation4], 4294967040  ;;  %v28_v0 = vstv %s120_s0  ;;  %s95_s16 = smov [#allocation6]   ;;  %v26_v1 = vld [vmem:[#allocation3] sm:$0xff]  ;;  %v27_v2 = vld [vmem:[#allocation3 + $0x8] sm:$0xff] }
   0xe   :  { %s39_s17 = sshll.u32 %s95_s16, 4  ;;  %v29_v3 = vmul.f32 %v28_v0, %v26_v1  ;;  %v30_v4 = vmul.f32 %v28_v0, %v27_v2  ;;  %s40_s17 = int_to_ptr.vmem [resolvable:$true] %s39_s17 }
   0xf   :  { %s70_s18 = scalar_lea.vmem %s40_s17, 256  ;;  %p75_p6 = scmp.lt.s32.totalorder %s40_s17, %s40_s17 }
  0x10   :  { %31 = vst [vmem:[#allocation6] sm:$0xff] %v29_v3  ;;  %32 = vst [vmem:[#allocation6 + $0x8] sm:$0xff] %v30_v4  ;;  %p71_p5 = scmp.ne.s32.totalorder %s40_s17, %s70_s18  ;;  %p76_p7 = scmp.lt.s32.totalorder %s70_s18, %s70_s18 }
  0x12   :  { %p77_p8 = por %p76_p7, %p75_p6 }
  0x14   :  { %p78_p9 = pnand %p77_p8, %p71_p5 }
  0x16   :  { %81 = shalt.err (!%p78_p9)
}
  0x17   :  { %42 = dma.vmem_to_hbm [thread:$0]  %s40_s17, 256, %s122_s2, [#allocation5]  }
  0x18   :  { %92 = dma.done.wait [#allocation5], 256  }
  0x19   :  { %93 = vsyncadd [#allocation5], 4294967040 }
  0x1a   :  { %46 = vsyncpa [#allocation4], 1 }
  0x1b   :  { %47 = vsyncpa [#allocation5], 1 }

</bundles_post_ra>
